<compile_context>
chip_gen: v7x
topology: tpu7x:2x2x1
jax: 0.10.0
libtpu: 0.0.40
codegen_flags: <defaults>
</compile_context>

<pallas_src>
import functools

import jax
import jax.numpy as jnp
from jax.experimental import pallas as pl
from jax.experimental.pallas import tpu as pltpu


def _round_up(x, m):
    return (x + m - 1) // m * m


def _pick_tile(extent, candidates):
    """Largest candidate that evenly divides `extent` (extent % 128 == 0)."""
    for c in candidates:
        if extent % c == 0:
            return c
    return candidates[-1]


# --------------------- kernel #1: bat weight transform -----------------------
def _bat_weight_kernel(alpha_ref, mask_ref, w_ref, u_ref, noise_ref, o_ref):
    """eff = weight + (bat(update, alpha)*mask + update*(1-mask)),
    cast to bf16 then transposed -> lane-dense (CKK, OC) bf16 layout."""
    alpha = alpha_ref[0]
    mask = mask_ref[0]
    u = u_ref[...]
    # bat.forward in f32 with a TRUE divide (exact w.r.t. PyTorch):
    #   x_int = clamp(floor(0.5*(u/alpha + 1) + U[0,1)), 0, 1)
    x_int = jnp.clip(
        jnp.floor(0.5 * (u / alpha + 1.0) + noise_ref[...]), 0.0, 1.0)
    bat_out = (2.0 * x_int - 1.0) * alpha
    eff = w_ref[...] + bat_out * mask + u * (1.0 - mask)
    # cast first, then transpose: half the vregs through the XLU.
    o_ref[...] = jnp.transpose(eff.astype(o_ref.dtype))


# --------------- kernel #2a: matmul with VMEM-resident weight ----------------
def _matmul_resident_kernel(tk, p_ref, w_ref, o_ref, acc_ref):
    kk = pl.program_id(1)

    @pl.when(kk == 0)
    def _():
        acc_ref[...] = jnp.zeros_like(acc_ref)

    k0 = pl.multiple_of(kk * tk, tk)
    acc_ref[...] += jnp.dot(p_ref[...], w_ref[pl.ds(k0, tk), :],
                            preferred_element_type=jnp.float32)

    @pl.when(kk == pl.num_programs(1) - 1)
    def _():
        o_ref[...] = acc_ref[...].astype(o_ref.dtype)


# ------------- kernel #2b: standard (M, OC, K)-tiled matmul fallback ---------
def _matmul_tiled_kernel(p_ref, w_ref, o_ref, acc_ref):
    kk = pl.program_id(2)

    @pl.when(kk == 0)
    def _():
        acc_ref[...] = jnp.zeros_like(acc_ref)

    acc_ref[...] += jnp.dot(p_ref[...], w_ref[...],
                            preferred_element_type=jnp.float32)

    @pl.when(kk == pl.num_programs(2) - 1)
    def _():
        o_ref[...] = acc_ref[...].astype(o_ref.dtype)


def _im2col(x, ksize, stride, padding):
    """x: (N, C, H, W) -> patches (N*OH*OW, C*K*K), feature order (C, KH, KW).
    Runs in x's dtype (bf16 here) so the materialized slab is half-size."""
    n, c, h, w = x.shape
    oh = (h + 2 * padding - ksize) // stride + 1
    ow = (w + 2 * padding - ksize) // stride + 1
    xp = jnp.pad(x, ((0, 0), (0, 0), (padding, padding), (padding, padding)))
    cols = []
    for kh in range(ksize):
        for kw in range(ksize):
            cols.append(
                xp[:, :,
                   kh:kh + stride * (oh - 1) + 1:stride,
                   kw:kw + stride * (ow - 1) + 1:stride])
    patches = jnp.stack(cols, axis=2)           # (N, C, K*K, OH, OW)
    patches = patches.transpose(0, 3, 4, 1, 2)  # (N, OH, OW, C, K*K)
    return patches.reshape(n * oh * ow, c * ksize * ksize), oh, ow


@functools.partial(jax.jit, static_argnames=("stride", "padding"))
def bat_conv2d_forward(x, weight, update, alpha_p, rho, alpha0, mask, noise,
                       *, stride, padding):
    oc, c, k, _ = weight.shape
    ckk = c * k * k

    # scalar alpha (parameter glue, identical to the PyTorch forward).
    alpha = jnp.clip(alpha0 * jnp.exp(rho * alpha_p), 0.0005, 0.05).astype(jnp.float32)
    # NOTE: PyTorch module's mask is a scalar tensor (0.0); scalar semantics assumed.
    # TODO(synk): per-element mask would need a third tiled input in kernel #1.
    mask_f = jnp.asarray(mask, jnp.float32)

    # lane/MXU-friendly padded sizes (zero padding; padded CKK columns of the
    # patch slab are zero and padded OC/M rows are sliced off -> exact).
    oc_pad = _round_up(oc, 128)
    ckk_pad = _round_up(ckk, 128)

    # ---- Pallas kernel #1: bat + mask-mix + weight add -> transposed bf16 ----
    pad2d = ((0, oc_pad - oc), (0, ckk_pad - ckk))
    w2d = jnp.pad(weight.reshape(oc, ckk), pad2d)
    u2d = jnp.pad(update.reshape(oc, ckk), pad2d)
    n2d = jnp.pad(noise.reshape(oc, ckk), pad2d)

    toc = _pick_tile(oc_pad, (256, 128))
    tkk = _pick_tile(ckk_pad, (256, 128))
    wspec = pl.BlockSpec((toc, tkk), lambda i, j: (i, j))
    eff_wT = pl.pallas_call(
        _bat_weight_kernel,
        out_shape=jax.ShapeDtypeStruct((ckk_pad, oc_pad), jnp.bfloat16),
        grid=(oc_pad // toc, ckk_pad // tkk),
        in_specs=[
            pl.BlockSpec(memory_space=pltpu.MemorySpace.SMEM),   # alpha
            pl.BlockSpec(memory_space=pltpu.MemorySpace.SMEM),   # mask
            wspec, wspec, wspec,                                 # weight/update/noise
        ],
        out_specs=pl.BlockSpec((tkk, toc), lambda i, j: (j, i)),
        compiler_params=pltpu.CompilerParams(
            dimension_semantics=("parallel", "parallel")),
    )(alpha.reshape(1), mask_f.reshape(1), w2d, u2d, n2d)

    # ---- im2col in bf16 (XLA data-movement glue) ----
    # TODO(synk): fold the strided patch extraction into kernel #2 (in-kernel
    # gather over (kh,kw) on padded NHWC input) to avoid the K*K-x HBM copy.
    patches, oh, ow = _im2col(x.astype(jnp.bfloat16), k, stride, padding)
    n = x.shape[0]
    m = n * oh * ow

    # M tile: bias towards >=4 parallel blocks (v7x megacore) and cap the
    # per-M-tile accumulator + output buffers when OC is large.
    m128 = _round_up(m, 128)
    if m128 >= 4096:
        tm = 512
    elif m128 >= 1024:
        tm = 256
    else:
        tm = 128
    # acc (f32) + double-buffered bf16 output = 8 bytes/elem of the out block.
    while tm > 128 and tm * oc_pad * 8 > (8 << 20):
        tm //= 2
    mp = _round_up(m, tm)
    # K (reduction) tile: multiples of 256 keep a clean MXU cadence on v6e/v7x.
    tk = _pick_tile(ckk_pad, (512, 256, 128))

    patches = jnp.pad(patches, ((0, mp - m), (0, ckk_pad - ckk)))

    # Keep the whole effective weight VMEM-resident when it fits the budget.
    w_resident = ckk_pad * oc_pad * 2 <= (8 << 20)

    if w_resident:
        vmem_needed = (2 * tm * tk * 2            # patches double buffer
                       + 2 * ckk_pad * oc_pad * 2  # resident weight (2 bufs worst case)
                       + tm * oc_pad * 4           # f32 accumulator
                       + 2 * tm * oc_pad * 2)      # bf16 output double buffer
    else:
        tn = _pick_tile(oc_pad, (256, 128))
        vmem_needed = (2 * tm * tk * 2 + 2 * tk * tn * 2
                       + tm * tn * 4 + 2 * tm * tn * 2)
    # Explicit scoped-VMEM limit: v5e defaults to only 16 MiB; cap well below
    # v7x's 64 MiB physical VMEM.
    vmem_limit = int(min(max(vmem_needed + (8 << 20), 16 << 20), 48 << 20))

    # ---- Pallas kernel #2: conv as bf16 tiled matmul, f32 accumulation ----
    if w_resident:
        cost = pl.CostEstimate(
            flops=2 * mp * ckk_pad * oc_pad,
            transcendentals=0,
            bytes_accessed=(mp * ckk_pad * 2           # patches read (bf16)
                            + ckk_pad * oc_pad * 2     # weight read once
                            + mp * oc_pad * 2),        # bf16 output write
        )
        out2d = pl.pallas_call(
            functools.partial(_matmul_resident_kernel, tk),
            out_shape=jax.ShapeDtypeStruct((mp, oc_pad), jnp.bfloat16),
            grid=(mp // tm, ckk_pad // tk),
            in_specs=[
                pl.BlockSpec((tm, tk), lambda i, kk: (i, kk)),         # patches tile
                pl.BlockSpec((ckk_pad, oc_pad), lambda i, kk: (0, 0)),  # resident weight
            ],
            out_specs=pl.BlockSpec((tm, oc_pad), lambda i, kk: (i, 0)),
            scratch_shapes=[pltpu.VMEM((tm, oc_pad), jnp.float32)],
            compiler_params=pltpu.CompilerParams(
                dimension_semantics=("parallel", "arbitrary"),
                vmem_limit_bytes=vmem_limit),
            cost_estimate=cost,
        )(patches, eff_wT)
    else:
        cost = pl.CostEstimate(
            flops=2 * mp * ckk_pad * oc_pad,
            transcendentals=0,
            bytes_accessed=(mp * ckk_pad * 2
                            + (mp // tm) * ckk_pad * oc_pad * 2
                            + mp * oc_pad * 2),
        )
        out2d = pl.pallas_call(
            _matmul_tiled_kernel,
            out_shape=jax.ShapeDtypeStruct((mp, oc_pad), jnp.bfloat16),
            grid=(mp // tm, oc_pad // tn, ckk_pad // tk),
            in_specs=[
                pl.BlockSpec((tm, tk), lambda i, j, kk: (i, kk)),   # patches tile
                pl.BlockSpec((tk, tn), lambda i, j, kk: (kk, j)),   # weight tile
            ],
            out_specs=pl.BlockSpec((tm, tn), lambda i, j, kk: (i, j)),
            scratch_shapes=[pltpu.VMEM((tm, tn), jnp.float32)],
            compiler_params=pltpu.CompilerParams(
                dimension_semantics=("parallel", "parallel", "arbitrary"),
                vmem_limit_bytes=vmem_limit),
            cost_estimate=cost,
        )(patches, eff_wT)

    # NCHW is part of the module contract: single transpose on the sliced bf16
    # slab, cast back to f32 fused with the same copy.
    out = (out2d[:m, :oc].reshape(n, oh, ow, oc)
           .transpose(0, 3, 1, 2).astype(jnp.float32))
    return out


def reference_forward(x, weight, update, alpha_p, rho, alpha0, mask, noise,
                      stride, padding):
    """Pure-JAX f32 reference matching the PyTorch semantics (same noise)."""
    alpha = jnp.clip(alpha0 * jnp.exp(rho * alpha_p), 0.0005, 0.05)
    x_int = jnp.clip(jnp.floor(0.5 * (update / alpha + 1.0) + noise), 0.0, 1.0)
    bat_out = (2.0 * x_int - 1.0) * alpha
    upd = bat_out * mask + update * (1.0 - mask)
    return jax.lax.conv_general_dilated(
        x, weight + upd, (stride, stride), [(padding, padding)] * 2,
        dimension_numbers=("NCHW", "OIHW", "NCHW"),
        precision=jax.lax.Precision.HIGHEST)


if __name__ == "__main__":
    key = jax.random.PRNGKey(0)
    k_x, k_w, k_u, k_n = jax.random.split(key, 4)

    N, C, H, W = 2, 4, 16, 16
    OC, K, STRIDE, PAD = 8, 3, 1, 1

    x = jax.random.normal(k_x, (N, C, H, W), jnp.float32)
    # __init__: weight ~ N(0, 0.01); update is zeros in __init__ -- use small
    # deterministic random values so the bat/mask path is numerically
    # exercised; alpha=0, rho=0, alpha0=0.01, mask=0 (module defaults).
    weight = 0.01 * jax.random.normal(k_w, (OC, C, K, K), jnp.float32)
    update = 0.02 * jax.random.normal(k_u, (OC, C, K, K), jnp.float32)
    noise = jax.random.uniform(k_n, (OC, C, K, K), jnp.float32)  # torch.rand_like
    alpha_p = jnp.float32(0.0)
    rho = jnp.float32(0.0)
    alpha0 = jnp.float32(0.01)
    mask = jnp.float32(0.0)

    out = bat_conv2d_forward(x, weight, update, alpha_p, rho, alpha0, mask, noise,
                             stride=STRIDE, padding=PAD)
    out = jax.block_until_ready(out)

    ref = reference_forward(x, weight, update, alpha_p, rho, alpha0, mask, noise,
                            STRIDE, PAD)
    assert out.shape == (N, OC, H, W), out.shape
    # bf16 matmul operands / bf16 output with f32 accumulation -> looser atol.
    assert jnp.allclose(out, ref, atol=1e-2, rtol=5e-2), \
        float(jnp.max(jnp.abs(out - ref)))
    print("KERNEL_OK")
</pallas_src>

<mosaic_0001>
module attributes {stable_mosaic.version = 11 : i64} {
  func.func @_bat_weight_kernel(%arg0: i32, %arg1: i32, %arg2: memref<1xf32, #tpu.memory_space<smem>>, %arg3: memref<1xf32, #tpu.memory_space<smem>>, %arg4: memref<128x128xf32, #tpu.memory_space<vmem>>, %arg5: memref<128x128xf32, #tpu.memory_space<vmem>>, %arg6: memref<128x128xf32, #tpu.memory_space<vmem>>, %arg7: memref<128x128xbf16, #tpu.memory_space<vmem>>) attributes {dimension_semantics = [#tpu.dimension_semantics<parallel>, #tpu.dimension_semantics<parallel>], iteration_bounds = array<i64: 1, 1>, scalar_prefetch = 0 : i64, scratch_operands = 0 : i64, tpu.core_type = #tpu.core_type<tc>, window_params = [{transform_indices = @transform_0, window_bounds = array<i64: 1>}, {transform_indices = @transform_1, window_bounds = array<i64: 1>}, {transform_indices = @transform_2, window_bounds = array<i64: 128, 128>}, {transform_indices = @transform_3, window_bounds = array<i64: 128, 128>}, {transform_indices = @transform_4, window_bounds = array<i64: 128, 128>}, {transform_indices = @transform_5, window_bounds = array<i64: 128, 128>}]} {
    %c0 = arith.constant 0 : index
    %0 = memref.load %arg2[%c0] : memref<1xf32, #tpu.memory_space<smem>>
    %c0_0 = arith.constant 0 : index
    %1 = memref.load %arg3[%c0_0] : memref<1xf32, #tpu.memory_space<smem>>
    %c0_1 = arith.constant 0 : index
    %c0_2 = arith.constant 0 : index
    %2 = vector.load %arg5[%c0_1, %c0_2] : memref<128x128xf32, #tpu.memory_space<vmem>>, vector<128x128xf32>
    %3 = vector.broadcast %0 : f32 to vector<128x128xf32>
    %4 = arith.divf %2, %3 : vector<128x128xf32>
    %cst = arith.constant 1.000000e+00 : f32
    %5 = vector.broadcast %cst : f32 to vector<128x128xf32>
    %6 = arith.addf %4, %5 : vector<128x128xf32>
    %cst_3 = arith.constant 5.000000e-01 : f32
    %7 = vector.broadcast %cst_3 : f32 to vector<128x128xf32>
    %8 = arith.mulf %7, %6 : vector<128x128xf32>
    %c0_4 = arith.constant 0 : index
    %c0_5 = arith.constant 0 : index
    %9 = vector.load %arg6[%c0_4, %c0_5] : memref<128x128xf32, #tpu.memory_space<vmem>>, vector<128x128xf32>
    %10 = arith.addf %8, %9 : vector<128x128xf32>
    %11 = math.floor %10 : vector<128x128xf32>
    %cst_6 = arith.constant 0.000000e+00 : f32
    %cst_7 = arith.constant 1.000000e+00 : f32
    %12 = vector.broadcast %cst_6 : f32 to vector<128x128xf32>
    %13 = arith.maximumf %12, %11 : vector<128x128xf32>
    %14 = vector.broadcast %cst_7 : f32 to vector<128x128xf32>
    %15 = arith.minimumf %14, %13 : vector<128x128xf32>
    %cst_8 = arith.constant 2.000000e+00 : f32
    %16 = vector.broadcast %cst_8 : f32 to vector<128x128xf32>
    %17 = arith.mulf %16, %15 : vector<128x128xf32>
    %cst_9 = arith.constant 1.000000e+00 : f32
    %18 = vector.broadcast %cst_9 : f32 to vector<128x128xf32>
    %19 = arith.subf %17, %18 : vector<128x128xf32>
    %20 = vector.broadcast %0 : f32 to vector<128x128xf32>
    %21 = arith.mulf %19, %20 : vector<128x128xf32>
    %c0_10 = arith.constant 0 : index
    %c0_11 = arith.constant 0 : index
    %22 = vector.load %arg4[%c0_10, %c0_11] : memref<128x128xf32, #tpu.memory_space<vmem>>, vector<128x128xf32>
    %23 = vector.broadcast %1 : f32 to vector<128x128xf32>
    %24 = arith.mulf %21, %23 : vector<128x128xf32>
    %25 = arith.addf %22, %24 : vector<128x128xf32>
    %cst_12 = arith.constant 1.000000e+00 : f32
    %26 = arith.subf %cst_12, %1 : f32
    %27 = vector.broadcast %26 : f32 to vector<128x128xf32>
    %28 = arith.mulf %2, %27 : vector<128x128xf32>
    %29 = arith.addf %25, %28 : vector<128x128xf32>
    %30 = arith.truncf %29 : vector<128x128xf32> to vector<128x128xbf16>
    %31 = tpu.transpose %30, [1, 0] : vector<128x128xbf16> -> vector<128x128xbf16>
    %c0_13 = arith.constant 0 : index
    %c0_14 = arith.constant 0 : index
    %32 = vector.load %arg7[%c0_13, %c0_14] : memref<128x128xbf16, #tpu.memory_space<vmem>>, vector<128x128xbf16>
    tpu.vector_store %arg7[%c0_13, %c0_14], %31 {strides = array<i32>} : memref<128x128xbf16, #tpu.memory_space<vmem>>, vector<128x128xbf16>,
    return
  }
  func.func @transform_0(%arg0: i32, %arg1: i32) -> i32 {
    %c0_i32 = arith.constant 0 : i32
    %c0_i32_0 = arith.constant 0 : i32
    return %c0_i32 : i32
  }
  func.func @transform_1(%arg0: i32, %arg1: i32) -> i32 {
    %c0_i32 = arith.constant 0 : i32
    %c0_i32_0 = arith.constant 0 : i32
    return %c0_i32 : i32
  }
  func.func @transform_2(%arg0: i32, %arg1: i32) -> (i32, i32) {
    %c0_i32 = arith.constant 0 : i32
    return %arg0, %arg1 : i32, i32
  }
  func.func @transform_3(%arg0: i32, %arg1: i32) -> (i32, i32) {
    %c0_i32 = arith.constant 0 : i32
    return %arg0, %arg1 : i32, i32
  }
  func.func @transform_4(%arg0: i32, %arg1: i32) -> (i32, i32) {
    %c0_i32 = arith.constant 0 : i32
    return %arg0, %arg1 : i32, i32
  }
  func.func @transform_5(%arg0: i32, %arg1: i32) -> (i32, i32) {
    %c0_i32 = arith.constant 0 : i32
    return %arg1, %arg0 : i32, i32
  }
}

module attributes {stable_mosaic.version = 11 : i64} {
  func.func @_matmul_resident_kernel(%arg0: i32, %arg1: i32, %arg2: memref<128x128xbf16, #tpu.memory_space<vmem>>, %arg3: memref<128x128xbf16, #tpu.memory_space<vmem>>, %arg4: memref<128x128xbf16, #tpu.memory_space<vmem>>, %arg5: memref<128x128xf32, #tpu.memory_space<vmem>>) attributes {dimension_semantics = [#tpu.dimension_semantics<parallel>, #tpu.dimension_semantics<arbitrary>], iteration_bounds = array<i64: 4, 1>, scalar_prefetch = 0 : i64, scratch_operands = 1 : i64, tpu.core_type = #tpu.core_type<tc>, window_params = [{transform_indices = @transform_0, window_bounds = array<i64: 128, 128>}, {pipeline_mode = #tpu.pipeline_mode<synchronous>, transform_indices = @transform_1, window_bounds = array<i64: 128, 128>}, {transform_indices = @transform_2, window_bounds = array<i64: 128, 128>}]} {
    %c0_i32 = arith.constant 0 : i32
    %0 = arith.cmpi eq, %arg1, %c0_i32 : i32
    %1 = arith.extui %0 : i1 to i32
    %c0_i32_0 = arith.constant 0 : i32
    %2 = arith.cmpi ne, %1, %c0_i32_0 : i32
    scf.if %2 {
      %cst_9 = arith.constant 0.000000e+00 : f32
      %15 = vector.broadcast %cst_9 : f32 to vector<128x128xf32>
      %c0_10 = arith.constant 0 : index
      %c0_11 = arith.constant 0 : index
      %16 = vector.load %arg5[%c0_10, %c0_11] : memref<128x128xf32, #tpu.memory_space<vmem>>, vector<128x128xf32>
      tpu.vector_store %arg5[%c0_10, %c0_11], %15 {strides = array<i32>} : memref<128x128xf32, #tpu.memory_space<vmem>>, vector<128x128xf32>,
    } else {
    }
    %c128_i32 = arith.constant 128 : i32
    %3 = arith.muli %arg1, %c128_i32 : i32
    %4 = tpu.assume_multiple %3, 128 : i32
    %c0 = arith.constant 0 : index
    %c0_1 = arith.constant 0 : index
    %5 = vector.load %arg5[%c0, %c0_1] : memref<128x128xf32, #tpu.memory_space<vmem>>, vector<128x128xf32>
    %c0_2 = arith.constant 0 : index
    %c0_3 = arith.constant 0 : index
    %6 = vector.load %arg2[%c0_2, %c0_3] : memref<128x128xbf16, #tpu.memory_space<vmem>>, vector<128x128xbf16>
    %7 = arith.index_cast %4 : i32 to index
    %c0_4 = arith.constant 0 : index
    %8 = vector.load %arg3[%7, %c0_4] : memref<128x128xbf16, #tpu.memory_space<vmem>>, vector<128x128xbf16>
    %cst = arith.constant dense<0.000000e+00> : vector<128x128xf32>
    %9 = tpu.matmul %6, %8, %cst {dimension_numbers = #tpu.dot_dimension_numbers<[1], [0], [0], [1], [0, 0, 1, 1], [], []>} : vector<128x128xbf16>, vector<128x128xbf16>, vector<128x128xf32> -> vector<128x128xf32>
    %10 = arith.addf %5, %9 : vector<128x128xf32>
    %c0_5 = arith.constant 0 : index
    %c0_6 = arith.constant 0 : index
    %11 = vector.load %arg5[%c0_5, %c0_6] : memref<128x128xf32, #tpu.memory_space<vmem>>, vector<128x128xf32>
    tpu.vector_store %arg5[%c0_5, %c0_6], %10 {strides = array<i32>} : memref<128x128xf32, #tpu.memory_space<vmem>>, vector<128x128xf32>,
    %c0_i32_7 = arith.constant 0 : i32
    %12 = arith.cmpi eq, %arg1, %c0_i32_7 : i32
    %13 = arith.extui %12 : i1 to i32
    %c0_i32_8 = arith.constant 0 : i32
    %14 = arith.cmpi ne, %13, %c0_i32_8 : i32
    scf.if %14 {
      %c0_9 = arith.constant 0 : index
      %c0_10 = arith.constant 0 : index
      %15 = vector.load %arg5[%c0_9, %c0_10] : memref<128x128xf32, #tpu.memory_space<vmem>>, vector<128x128xf32>
      %16 = arith.truncf %15 : vector<128x128xf32> to vector<128x128xbf16>
      %c0_11 = arith.constant 0 : index
      %c0_12 = arith.constant 0 : index
      %17 = vector.load %arg4[%c0_11, %c0_12] : memref<128x128xbf16, #tpu.memory_space<vmem>>, vector<128x128xbf16>
      tpu.vector_store %arg4[%c0_11, %c0_12], %16 {strides = array<i32>} : memref<128x128xbf16, #tpu.memory_space<vmem>>, vector<128x128xbf16>,
    } else {
    }
    return
  }
  func.func @transform_0(%arg0: i32, %arg1: i32) -> (i32, i32) {
    %c0_i32 = arith.constant 0 : i32
    return %arg0, %arg1 : i32, i32
  }
  func.func @transform_1(%arg0: i32, %arg1: i32) -> (i32, i32) {
    %c0_i32 = arith.constant 0 : i32
    %c0_i32_0 = arith.constant 0 : i32
    %c0_i32_1 = arith.constant 0 : i32
    return %c0_i32, %c0_i32_0 : i32, i32
  }
  func.func @transform_2(%arg0: i32, %arg1: i32) -> (i32, i32) {
    %c0_i32 = arith.constant 0 : i32
    %c0_i32_0 = arith.constant 0 : i32
    return %arg0, %c0_i32 : i32, i32
  }
}

</mosaic_0001>

<bundles_post_ra>
// kernel: bat_conv2d_forward.2
= control target key start
LH: loop header
LB: loop body
LE: loop exit
PB: predicated region body
PF: predicated region fallthrough
CT: control target
= control target key end

     0   :  { %s814_s0 = inlined_call_operand.<no memory space> [shape: f32[1], index: 0, kind: input, shape index: {}]   ;;  %s815_s1 = inlined_call_operand.<no memory space> [shape: f32[1], index: 1, kind: input, shape index: {}]   ;;  %s816_s3 = inlined_call_operand.vmem [shape: f32[128,128], index: 3, kind: input, shape index: {}]   ;;  %s817_s4 = inlined_call_operand.vmem [shape: f32[128,128], index: 4, kind: input, shape index: {}]   ;;  %s818_s2 = inlined_call_operand.vmem [shape: f32[128,128], index: 2, kind: input, shape index: {}]   ;;  %s819_s5 = inlined_call_operand.vmem [shape: bf16[128,128], index: 5, kind: output, shape index: {}]  }
   0x1   :  { %v468_v0 = vstv %s814_s0  ;;  %s267_s22 = ssub.f32 1.0, %s815_s1  ;;  %v24_v2 = vld [vmem:[%s816_s3] sm:$0xff]  ;;  %v25_v3 = vld [vmem:[%s816_s3 + $0x8] sm:$0xff]  ;;  %v26_v4 = vld [vmem:[%s816_s3 + $0x10] sm:$0xff] }
   0x2   :  { %433 = vrcp.f32 %v468_v0  ;;  %v488_v5 = vstv %s815_s1  ;;  %v27_v6 = vld [vmem:[%s816_s3 + $0x18] sm:$0xff]  ;;  %v28_v7 = vld [vmem:[%s816_s3 + $0x20] sm:$0xff]  ;;  %v29_v8 = vld [vmem:[%s816_s3 + $0x28] sm:$0xff] }
   0x3   :  { %v474_v1 = vstv %s267_s22  ;;  %v30_v13 = vld [vmem:[%s816_s3 + $0x30] sm:$0xff]  ;;  %v31_v14 = vld [vmem:[%s816_s3 + $0x38] sm:$0xff]  ;;  %v520_v15 = vld [vmem:[%s816_s3 + $0x40] sm:$0xff] }
   0x4   :  { %v500_v9 = vmul.f32 %v474_v1, %v24_v2  ;;  %v503_v10 = vmul.f32 %v474_v1, %v25_v3  ;;  %v506_v11 = vmul.f32 %v474_v1, %v26_v4  ;;  %v509_v12 = vmul.f32 %v474_v1, %v27_v6  ;;  %v537_v20 = vld [vmem:[%s816_s3 + $0x48] sm:$0xff]  ;;  %v542_v21 = vld [vmem:[%s816_s3 + $0x50] sm:$0xff]  ;;  %v547_v22 = vld [vmem:[%s816_s3 + $0x58] sm:$0xff] }
   0x5   :  { %v523_v16 = vmul.f32 %v474_v1, %v28_v7  ;;  %v526_v17 = vmul.f32 %v474_v1, %v29_v8  ;;  %v529_v18 = vmul.f32 %v474_v1, %v30_v13  ;;  %v532_v19 = vmul.f32 %v474_v1, %v31_v14  ;;  %v90_v32 = vld [vmem:[%s817_s4] sm:$0xff]  ;;  %v91_v33 = vld [vmem:[%s817_s4 + $0x8] sm:$0xff]  ;;  %v92_v42 = vld [vmem:[%s817_s4 + $0x10] sm:$0xff] }
   0x6   :  { %v553_v24 = vmul.f32 %v474_v1, %v520_v15  ;;  %v557_v25 = vmul.f32 %v474_v1, %v537_v20  ;;  %v561_v26 = vmul.f32 %v474_v1, %v542_v21  ;;  %v565_v27 = vmul.f32 %v474_v1, %v547_v22  ;;  %v93_v43 = vld [vmem:[%s817_s4 + $0x18] sm:$0xff]  ;;  %v94_v46 = vld [vmem:[%s817_s4 + $0x20] sm:$0xff]  ;;  %v95_v47 = vld [vmem:[%s817_s4 + $0x28] sm:$0xff] }
   0x7   :  { %v96_v54 = vld [vmem:[%s817_s4 + $0x30] sm:$0xff]  ;;  %v97_v55 = vld [vmem:[%s817_s4 + $0x38] sm:$0xff] }
   0xc   :  { %v549_v23 = vpop.eup %433 }
   0xd   :  { %v42_v28 = vmul.f32 %v549_v23, %v24_v2  ;;  %v43_v29 = vmul.f32 %v549_v23, %v25_v3  ;;  %v44_v30 = vmul.f32 %v549_v23, %v26_v4  ;;  %v45_v31 = vmul.f32 %v549_v23, %v27_v6 }
   0xe   :  { %v46_v34 = vmul.f32 %v549_v23, %v28_v7  ;;  %v47_v35 = vmul.f32 %v549_v23, %v29_v8  ;;  %v48_v36 = vmul.f32 %v549_v23, %v30_v13  ;;  %v49_v37 = vmul.f32 %v549_v23, %v31_v14 }
   0xf   :  { %v58_v38 = vadd.f32 1.0, %v42_v28  ;;  %v59_v39 = vadd.f32 1.0, %v43_v29  ;;  %v60_v40 = vadd.f32 1.0, %v44_v30  ;;  %v61_v41 = vadd.f32 1.0, %v45_v31 }
  0x10   :  { %v62_v44 = vadd.f32 1.0, %v46_v34  ;;  %v63_v45 = vadd.f32 1.0, %v47_v35  ;;  %v64_v48 = vadd.f32 1.0, %v48_v36  ;;  %v65_v49 = vadd.f32 1.0, %v49_v37 }
  0x11   :  { %v74_v50 = vmul.f32 0.5, %v58_v38  ;;  %v75_v51 = vmul.f32 0.5, %v59_v39  ;;  %v76_v52 = vmul.f32 0.5, %v60_v40  ;;  %v77_v53 = vmul.f32 0.5, %v61_v41 }
  0x12   :  { %v78_v56 = vmul.f32 0.5, %v62_v44  ;;  %v79_v57 = vmul.f32 0.5, %v63_v45  ;;  %v80_v58 = vmul.f32 0.5, %v64_v48  ;;  %v81_v59 = vmul.f32 0.5, %v65_v49 }
  0x13   :  { %v106_v60 = vadd.f32 %v90_v32, %v74_v50  ;;  %v107_v61 = vadd.f32 %v91_v33, %v75_v51  ;;  %v108_v62 = vadd.f32 %v92_v42, %v76_v52  ;;  %v109_v63 = vadd.f32 %v93_v43, %v77_v53 }
  0x14   :  { %v110_v2 = vadd.f32 %v94_v46, %v78_v56  ;;  %v111_v3 = vadd.f32 %v95_v47, %v79_v57  ;;  %v112_v4 = vadd.f32 %v96_v54, %v80_v58  ;;  %v113_v6 = vadd.f32 %v97_v55, %v81_v59 }
  0x15   :  { %v122_v7 = vfloor.f32 %v106_v60  ;;  %v123_v8 = vfloor.f32 %v107_v61  ;;  %v124_v13 = vfloor.f32 %v108_v62  ;;  %v125_v14 = vfloor.f32 %v109_v63 }
  0x16   :  { %v126_v28 = vfloor.f32 %v110_v2  ;;  %v127_v29 = vfloor.f32 %v111_v3  ;;  %v128_v30 = vfloor.f32 %v112_v4  ;;  %v129_v31 = vfloor.f32 %v113_v6  ;;  %v218_v4 = vld [vmem:[%s818_s2] sm:$0xff]  ;;  %v219_v6 = vld [vmem:[%s818_s2 + $0x8] sm:$0xff] }
  0x17   :  { %v138_v34 = vmax.f32 %v122_v7, 0.0  ;;  %v139_v35 = vmax.f32 %v123_v8, 0.0  ;;  %v140_v36 = vmax.f32 %v124_v13, 0.0  ;;  %v141_v37 = vmax.f32 %v125_v14, 0.0  ;;  %v220_v13 = vld [vmem:[%s818_s2 + $0x10] sm:$0xff]  ;;  %v221_v14 = vld [vmem:[%s818_s2 + $0x18] sm:$0xff] }
  0x18   :  { %v142_v32 = vmax.f32 %v126_v28, 0.0  ;;  %v143_v33 = vmax.f32 %v127_v29, 0.0  ;;  %v144_v38 = vmax.f32 %v128_v30, 0.0  ;;  %v145_v39 = vmax.f32 %v129_v31, 0.0  ;;  %v222_v30 = vld [vmem:[%s818_s2 + $0x20] sm:$0xff] }
  0x19   :  { %v154_v40 = vmin.f32 %v138_v34, 1.0  ;;  %v155_v41 = vmin.f32 %v139_v35, 1.0  ;;  %v156_v42 = vmin.f32 %v140_v36, 1.0  ;;  %v157_v43 = vmin.f32 %v141_v37, 1.0 }
  0x1a   :  { %v158_v44 = vmin.f32 %v142_v32, 1.0  ;;  %v159_v45 = vmin.f32 %v143_v33, 1.0  ;;  %v160_v46 = vmin.f32 %v144_v38, 1.0  ;;  %v161_v47 = vmin.f32 %v145_v39, 1.0  ;;  %v223_v33 = vld [vmem:[%s818_s2 + $0x28] sm:$0xff]  ;;  %v224_v38 = vld [vmem:[%s818_s2 + $0x30] sm:$0xff] }
  0x1b   :  { %v170_v48 = vmul.f32 2.0, %v154_v40  ;;  %v171_v49 = vmul.f32 2.0, %v155_v41  ;;  %v172_v50 = vmul.f32 2.0, %v156_v42  ;;  %v173_v51 = vmul.f32 2.0, %v157_v43  ;;  %v225_v39 = vld [vmem:[%s818_s2 + $0x38] sm:$0xff] }
  0x1c   :  { %v174_v52 = vmul.f32 2.0, %v158_v44  ;;  %v175_v53 = vmul.f32 2.0, %v159_v45  ;;  %v176_v54 = vmul.f32 2.0, %v160_v46  ;;  %v177_v55 = vmul.f32 2.0, %v161_v47 }
  0x1d   :  { %v401_v56 = vadd.f32 -1.0, %v170_v48  ;;  %v402_v57 = vadd.f32 -1.0, %v171_v49  ;;  %v403_v58 = vadd.f32 -1.0, %v172_v50  ;;  %v404_v59 = vadd.f32 -1.0, %v173_v51 }
  0x1e   :  { %v405_v60 = vadd.f32 -1.0, %v174_v52  ;;  %v406_v61 = vadd.f32 -1.0, %v175_v53  ;;  %v407_v62 = vadd.f32 -1.0, %v176_v54  ;;  %v408_v63 = vadd.f32 -1.0, %v177_v55 }
  0x1f   :  { %v202_v2 = vmul.f32 %v401_v56, %v468_v0  ;;  %v203_v3 = vmul.f32 %v402_v57, %v468_v0  ;;  %v204_v7 = vmul.f32 %v403_v58, %v468_v0  ;;  %v205_v8 = vmul.f32 %v404_v59, %v468_v0 }
  0x20   :  { %v206_v28 = vmul.f32 %v405_v60, %v468_v0  ;;  %v207_v29 = vmul.f32 %v406_v61, %v468_v0  ;;  %v208_v31 = vmul.f32 %v407_v62, %v468_v0  ;;  %v209_v34 = vmul.f32 %v408_v63, %v468_v0 }
  0x21   :  { %v235_v35 = vmul.f32 %v488_v5, %v202_v2  ;;  %v236_v36 = vmul.f32 %v488_v5, %v203_v3  ;;  %v237_v37 = vmul.f32 %v488_v5, %v204_v7  ;;  %v238_v32 = vmul.f32 %v488_v5, %v205_v8  ;;  %v677_v3 = vld [vmem:[%s816_s3 + $0x78] sm:$0xff] }
  0x22   :  { %v239_v40 = vmul.f32 %v488_v5, %v206_v28  ;;  %v240_v41 = vmul.f32 %v488_v5, %v207_v29  ;;  %v241_v42 = vmul.f32 %v488_v5, %v208_v31  ;;  %v242_v43 = vmul.f32 %v488_v5, %v209_v34  ;;  %v100_v28 = vld [vmem:[%s817_s4 + $0x50] sm:$0xff]  ;;  %v101_v29 = vld [vmem:[%s817_s4 + $0x58] sm:$0xff] }
  0x23   :  { %v251_v44 = vadd.f32 %v235_v35, %v218_v4  ;;  %v252_v45 = vadd.f32 %v236_v36, %v219_v6  ;;  %v253_v46 = vadd.f32 %v237_v37, %v220_v13  ;;  %v254_v47 = vadd.f32 %v238_v32, %v221_v14  ;;  %v102_v36 = vld [vmem:[%s817_s4 + $0x60] sm:$0xff]  ;;  %v103_v37 = vld [vmem:[%s817_s4 + $0x68] sm:$0xff] }
  0x24   :  { %v255_v48 = vadd.f32 %v239_v40, %v222_v30  ;;  %v256_v49 = vadd.f32 %v240_v41, %v223_v33  ;;  %v257_v50 = vadd.f32 %v241_v42, %v224_v38  ;;  %v258_v51 = vadd.f32 %v242_v43, %v225_v39 }
  0x25   :  { %v285_v52 = vadd.f32 %v500_v9, %v251_v44  ;;  %v286_v53 = vadd.f32 %v503_v10, %v252_v45  ;;  %v287_v54 = vadd.f32 %v506_v11, %v253_v46  ;;  %v288_v55 = vadd.f32 %v509_v12, %v254_v47  ;;  %v36_v9 = vld [vmem:[%s816_s3 + $0x60] sm:$0xff]  ;;  %v37_v10 = vld [vmem:[%s816_s3 + $0x68] sm:$0xff] }
  0x26   :  { %v289_v56 = vadd.f32 %v523_v16, %v255_v48  ;;  %v290_v57 = vadd.f32 %v526_v17, %v256_v49  ;;  %v646_v58 = vadd.f32 %v529_v18, %v257_v50  ;;  %v649_v59 = vadd.f32 %v532_v19, %v258_v51  ;;  %v104_v50 = vld [vmem:[%s817_s4 + $0x70] sm:$0xff] }
  0x27   :  { %v301_v11 = vpack.c.bf16 %v286_v53, %v285_v52  ;;  %v302_v12 = vpack.c.bf16 %v288_v55, %v287_v54  ;;  %v50_v16 = vmul.f32 %v549_v23, %v520_v15  ;;  %v51_v17 = vmul.f32 %v549_v23, %v537_v20  ;;  %v672_v20 = vld [vmem:[%s816_s3 + $0x70] sm:$0xff] }
  0x28   :  { %v303_v18 = vpack.c.bf16 %v290_v57, %v289_v56  ;;  %v304_v19 = vpack.c.bf16 %v649_v59, %v646_v58  ;;  %v52_v60 = vmul.f32 %v549_v23, %v542_v21  ;;  %v53_v61 = vmul.f32 %v549_v23, %v547_v22  ;;  %v98_v21 = vld [vmem:[%s817_s4 + $0x40] sm:$0xff]  ;;  %v99_v22 = vld [vmem:[%s817_s4 + $0x48] sm:$0xff] }
  0x29   :  { %309 = vxpose.xlu0.c.b16.start [1/8] %v301_v11, 128  ;;  %v66_v62 = vadd.f32 1.0, %v50_v16  ;;  %v67_v63 = vadd.f32 1.0, %v51_v17  ;;  %v54_v2 = vmul.f32 %v549_v23, %v36_v9  ;;  %v55_v15 = vmul.f32 %v549_v23, %v37_v10 }
  0x2a   :  { %v68_v4 = vadd.f32 1.0, %v52_v60  ;;  %v69_v6 = vadd.f32 1.0, %v53_v61  ;;  %v686_v7 = vmul.f32 %v474_v1, %v36_v9  ;;  %v689_v8 = vmul.f32 %v474_v1, %v37_v10 }
  0x2b   :  { %v82_v13 = vmul.f32 0.5, %v66_v62  ;;  %v83_v14 = vmul.f32 0.5, %v67_v63  ;;  %v70_v30 = vadd.f32 1.0, %v54_v2  ;;  %v71_v31 = vadd.f32 1.0, %v55_v15 }
  0x2c   :  { %v84_v34 = vmul.f32 0.5, %v68_v4  ;;  %v85_v35 = vmul.f32 0.5, %v69_v6  ;;  %v56_v32 = vmul.f32 %v549_v23, %v672_v20  ;;  %v57_v33 = vmul.f32 %v549_v23, %v677_v3  ;;  %v105_v23 = vld [vmem:[%s817_s4 + $0x78] sm:$0xff] }
  0x2d   :  { %310 = vxpose.xlu0.c.b16.cont [2/8] %v302_v12, 128  ;;  %v114_v38 = vadd.f32 %v98_v21, %v82_v13  ;;  %v115_v39 = vadd.f32 %v99_v22, %v83_v14  ;;  %v86_v40 = vmul.f32 0.5, %v70_v30  ;;  %v87_v41 = vmul.f32 0.5, %v71_v31 }
  0x2e   :  { %v116_v42 = vadd.f32 %v100_v28, %v84_v34  ;;  %v117_v43 = vadd.f32 %v101_v29, %v85_v35  ;;  %v72_v44 = vadd.f32 1.0, %v56_v32  ;;  %v73_v45 = vadd.f32 1.0, %v57_v33 }
  0x2f   :  { %v130_v46 = vfloor.f32 %v114_v38  ;;  %v131_v47 = vfloor.f32 %v115_v39  ;;  %v118_v48 = vadd.f32 %v102_v36, %v86_v40  ;;  %v119_v49 = vadd.f32 %v103_v37, %v87_v41  ;;  %v226_v39 = vld [vmem:[%s818_s2 + $0x40] sm:$0xff]  ;;  %v227_v40 = vld [vmem:[%s818_s2 + $0x48] sm:$0xff] }
  0x30   :  { %v132_v51 = vfloor.f32 %v116_v42  ;;  %v133_v52 = vfloor.f32 %v117_v43  ;;  %v88_v53 = vmul.f32 0.5, %v72_v44  ;;  %v89_v54 = vmul.f32 0.5, %v73_v45 }
  0x31   :  { %311 = vxpose.xlu0.c.b16.cont [3/8] %v303_v18, 128  ;;  %v146_v55 = vmax.f32 %v130_v46, 0.0  ;;  %v147_v56 = vmax.f32 %v131_v47, 0.0  ;;  %v134_v57 = vfloor.f32 %v118_v48  ;;  %v135_v9 = vfloor.f32 %v119_v49  ;;  %v228_v47 = vld [vmem:[%s818_s2 + $0x50] sm:$0xff]  ;;  %v229_v48 = vld [vmem:[%s818_s2 + $0x58] sm:$0xff] }
  0x32   :  { %v148_v10 = vmax.f32 %v132_v51, 0.0  ;;  %v149_v11 = vmax.f32 %v133_v52, 0.0  ;;  %v120_v12 = vadd.f32 %v104_v50, %v88_v53  ;;  %v121_v16 = vadd.f32 %v105_v23, %v89_v54  ;;  %v230_v52 = vld [vmem:[%s818_s2 + $0x60] sm:$0xff]  ;;  %v231_v53 = vld [vmem:[%s818_s2 + $0x68] sm:$0xff] }
  0x33   :  { %v162_v17 = vmin.f32 %v146_v55, 1.0  ;;  %v163_v60 = vmin.f32 %v147_v56, 1.0  ;;  %v150_v61 = vmax.f32 %v134_v57, 0.0  ;;  %v151_v62 = vmax.f32 %v135_v9, 0.0 }
  0x34   :  { %v164_v63 = vmin.f32 %v148_v10, 1.0  ;;  %v165_v2 = vmin.f32 %v149_v11, 1.0  ;;  %v136_v15 = vfloor.f32 %v120_v12  ;;  %v137_v21 = vfloor.f32 %v121_v16 }
  0x35   :  { %312 = vxpose.xlu0.c.b16.cont [4/8] %v304_v19, 128  ;;  %v178_v18 = vmul.f32 2.0, %v162_v17  ;;  %v179_v22 = vmul.f32 2.0, %v163_v60  ;;  %v166_v4 = vmin.f32 %v150_v61, 1.0  ;;  %v167_v6 = vmin.f32 %v151_v62, 1.0 }
  0x36   :  { %v180_v13 = vmul.f32 2.0, %v164_v63  ;;  %v181_v14 = vmul.f32 2.0, %v165_v2  ;;  %v152_v28 = vmax.f32 %v136_v15, 0.0  ;;  %v153_v29 = vmax.f32 %v137_v21, 0.0  ;;  %v232_v21 = vld [vmem:[%s818_s2 + $0x70] sm:$0xff] }
  0x37   :  { %v409_v30 = vadd.f32 -1.0, %v178_v18  ;;  %v410_v31 = vadd.f32 -1.0, %v179_v22  ;;  %v182_v34 = vmul.f32 2.0, %v166_v4  ;;  %v183_v35 = vmul.f32 2.0, %v167_v6  ;;  %v233_v18 = vld [vmem:[%s818_s2 + $0x78] sm:$0xff] }
  0x38   :  { %v411_v36 = vadd.f32 -1.0, %v180_v13  ;;  %v412_v37 = vadd.f32 -1.0, %v181_v14  ;;  %v168_v32 = vmin.f32 %v152_v28, 1.0  ;;  %v169_v33 = vmin.f32 %v153_v29, 1.0 }
  0x39   :  { %v210_v38 = vmul.f32 %v409_v30, %v468_v0  ;;  %v211_v58 = vmul.f32 %v410_v31, %v468_v0  ;;  %v413_v59 = vadd.f32 -1.0, %v182_v34  ;;  %v414_v19 = vadd.f32 -1.0, %v183_v35 }
  0x3a   :  { %v212_v41 = vmul.f32 %v411_v36, %v468_v0  ;;  %v213_v42 = vmul.f32 %v412_v37, %v468_v0  ;;  %v184_v43 = vmul.f32 2.0, %v168_v32  ;;  %v185_v44 = vmul.f32 2.0, %v169_v33 }
  0x3b   :  { %v243_v45 = vmul.f32 %v488_v5, %v210_v38  ;;  %v244_v46 = vmul.f32 %v488_v5, %v211_v58  ;;  %v214_v49 = vmul.f32 %v413_v59, %v468_v0  ;;  %v215_v50 = vmul.f32 %v414_v19, %v468_v0 }
  0x3c   :  { %v245_v23 = vmul.f32 %v488_v5, %v212_v41  ;;  %v246_v51 = vmul.f32 %v488_v5, %v213_v42  ;;  %v415_v54 = vadd.f32 -1.0, %v184_v43  ;;  %v416_v55 = vadd.f32 -1.0, %v185_v44 }
  0x3d   :  { %v259_v56 = vadd.f32 %v243_v45, %v226_v39  ;;  %v260_v57 = vadd.f32 %v244_v46, %v227_v40  ;;  %v247_v9 = vmul.f32 %v488_v5, %v214_v49  ;;  %v248_v10 = vmul.f32 %v488_v5, %v215_v50 }
  0x3e   :  { %v261_v11 = vadd.f32 %v245_v23, %v228_v47  ;;  %v262_v12 = vadd.f32 %v246_v51, %v229_v48  ;;  %v216_v16 = vmul.f32 %v415_v54, %v468_v0  ;;  %v217_v17 = vmul.f32 %v416_v55, %v468_v0 }
  0x3f   :  { %v293_v60 = vadd.f32 %v553_v24, %v259_v56  ;;  %v294_v61 = vadd.f32 %v557_v25, %v260_v57  ;;  %v263_v62 = vadd.f32 %v247_v9, %v230_v52  ;;  %v264_v63 = vadd.f32 %v248_v10, %v231_v53 }
  0x40   :  { %v295_v2 = vadd.f32 %v561_v26, %v261_v11  ;;  %v296_v15 = vadd.f32 %v565_v27, %v262_v12  ;;  %v249_v0 = vmul.f32 %v488_v5, %v216_v16  ;;  %v250_v24 = vmul.f32 %v488_v5, %v217_v17 }
  0x41   :  { %v305_v22 = vpack.c.bf16 %v294_v61, %v293_v60  ;;  %v297_v25 = vadd.f32 %v686_v7, %v263_v62  ;;  %v298_v4 = vadd.f32 %v689_v8, %v264_v63  ;;  %v283_v26 = vmul.f32 %v474_v1, %v672_v20 }
  0x42   :  { %v306_v27 = vpack.c.bf16 %v296_v15, %v295_v2  ;;  %v265_v6 = vadd.f32 %v249_v0, %v232_v21  ;;  %v266_v13 = vadd.f32 %v250_v24, %v233_v18  ;;  %v284_v14 = vmul.f32 %v474_v1, %v677_v3 }
  0x43   :  { %313 = vxpose.xlu0.c.b16.cont [5/8] %v305_v22, 128  ;;  %v307_v28 = vpack.c.bf16 %v298_v4, %v297_v25 }
  0x44   :  { %v299_v29 = vadd.f32 %v283_v26, %v265_v6  ;;  %v300_v30 = vadd.f32 %v284_v14, %v266_v13 }
  0x46   :  { %v308_v5 = vpack.c.bf16 %v300_v30, %v299_v29 }
  0x47   :  { %314 = vxpose.xlu0.c.b16.cont [6/8] %v306_v27, 128 }
  0x4b   :  { %315 = vxpose.xlu0.c.b16.cont [7/8] %v307_v28, 128 }
  0x4f   :  { %316 = vxpose.xlu0.c.b16.end [8/8] %v308_v5, 128 }
  0x99   :  { %v317_v7 = vpop.trf.xlu0 }
  0x9a   :  { %v417_v31 = vcombine.low %v317_v7, %v317_v7  ;;  %v418_v8 = vcombine.high %v317_v7, %v317_v7 }
  0x9c   :  { %381 = vst [vmem:[%s819_s5] sm:$0xf] %v417_v31  ;;  %382 = vst [vmem:[%s819_s5 + $0x4] sm:$0xf] %v418_v8 }
  0x9d   :  { %v318_v20 = vpop.trf.xlu0 }
  0x9e   :  { %v419_v1 = vcombine.low %v318_v20, %v318_v20  ;;  %v420_v3 = vcombine.high %v318_v20, %v318_v20 }
  0xa0   :  { %383 = vst [vmem:[%s819_s5 + $0x8] sm:$0xf] %v419_v1  ;;  %384 = vst [vmem:[%s819_s5 + $0xc] sm:$0xf] %v420_v3 }
  0xa1   :  { %v319_v34 = vpop.trf.xlu0 }
  0xa2   :  { %v421_v35 = vcombine.low %v319_v34, %v319_v34  ;;  %v422_v36 = vcombine.high %v319_v34, %v319_v34 }
  0xa4   :  { %385 = vst [vmem:[%s819_s5 + $0x10] sm:$0xf] %v421_v35  ;;  %386 = vst [vmem:[%s819_s5 + $0x14] sm:$0xf] %v422_v36 }
  0xa5   :  { %v320_v37 = vpop.trf.xlu0 }
  0xa6   :  { %v423_v32 = vcombine.low %v320_v37, %v320_v37  ;;  %v424_v33 = vcombine.high %v320_v37, %v320_v37 }
  0xa8   :  { %387 = vst [vmem:[%s819_s5 + $0x18] sm:$0xf] %v423_v32  ;;  %388 = vst [vmem:[%s819_s5 + $0x1c] sm:$0xf] %v424_v33 }
  0xa9   :  { %v321_v38 = vpop.trf.xlu0 }
  0xaa   :  { %v425_v58 = vcombine.low %v321_v38, %v321_v38  ;;  %v426_v59 = vcombine.high %v321_v38, %v321_v38 }
  0xac   :  { %389 = vst [vmem:[%s819_s5 + $0x20] sm:$0xf] %v425_v58  ;;  %390 = vst [vmem:[%s819_s5 + $0x24] sm:$0xf] %v426_v59 }
  0xad   :  { %v322_v19 = vpop.trf.xlu0 }
  0xae   :  { %v427_v39 = vcombine.low %v322_v19, %v322_v19  ;;  %v428_v40 = vcombine.high %v322_v19, %v322_v19 }
  0xb0   :  { %391 = vst [vmem:[%s819_s5 + $0x28] sm:$0xf] %v427_v39  ;;  %392 = vst [vmem:[%s819_s5 + $0x2c] sm:$0xf] %v428_v40 }
  0xb1   :  { %v323_v41 = vpop.trf.xlu0 }
  0xb2   :  { %v429_v42 = vcombine.low %v323_v41, %v323_v41  ;;  %v430_v43 = vcombine.high %v323_v41, %v323_v41 }
  0xb4   :  { %393 = vst [vmem:[%s819_s5 + $0x30] sm:$0xf] %v429_v42  ;;  %394 = vst [vmem:[%s819_s5 + $0x34] sm:$0xf] %v430_v43 }
  0xb5   :  { %v324_v44 = vpop.trf.xlu0 }
  0xb6   :  { %v431_v45 = vcombine.low %v324_v44, %v324_v44  ;;  %v432_v46 = vcombine.high %v324_v44, %v324_v44 }
  0xb8   :  { %395 = vst [vmem:[%s819_s5 + $0x38] sm:$0xf] %v431_v45  ;;  %396 = vst [vmem:[%s819_s5 + $0x3c] sm:$0xf] %v432_v46 }

// kernel: bat_conv2d_forward.3
= control target key start
LH: loop header
LB: loop body
LE: loop exit
PB: predicated region body
PF: predicated region fallthrough
CT: control target
= control target key end

     0   :  { %s887_s9 = smov 0   ;;  %s889_s10 = smov 0   ;;  %s961_s0 = inlined_call_operand.vmem [shape: bf16[512,128], index: 0, kind: input, shape index: {}]   ;;  %s962_s1 = inlined_call_operand.vmem [shape: bf16[128,128], index: 1, kind: input, shape index: {}]   ;;  %s963_s2 = inlined_call_operand.vmem [shape: bf16[512,128], index: 2, kind: output, shape index: {}]  }
   0x1   :  { %s891_s11 = smov 0  }
   0x2 LB: > { %s24_s12 = sadd.s32 1, %s866_s10  ;;  %p642_p0 = scmp.ge.s32.totalorder %s870_s11, 1  ;;  %s870_s11 = sphi %s891_s11, %s12_s11   ;;  %s866_s10 = sphi %s889_s10, %s965_s10   ;;  %s862_s9 = sphi %s887_s9, %s964_s9  }
   0x3   : > { %p26_p1 = scmp.ge.s32.totalorder %s24_s12, 4  ;;  %p130_p2 = scmp.lt.s32.totalorder %s870_s11, 5 }
   0x5   : > { %s967_s12 = smov (%p26_p1, %s24_s12), 0  ;;  %p131_p3 = pnand %p642_p0, %p130_p2 }
   0x6   : > { %v832_v0 = vld [vmem:[%s962_s1] sm:$0xff] (!%p131_p3)   ;;  %s643_s15 = sshll.u32 (!%p131_p3), %s862_s9, 4  ;;  %v833_v1 = vld [vmem:[%s962_s1 + $0x8] sm:$0xff] (!%p131_p3)   ;;  %v834_v2 = vld [vmem:[%s962_s1 + $0x10] sm:$0xff] (!%p131_p3)  }
   0x7   : > { %134 = sbr.rel (%p131_p3) target bundleno = 265 (0x109), region = 28  ;;  %p156_p4 = scmp.lt.s32.totalorder (!%p131_p3), %s643_s15, 63  ;;  %760 = vmatprep.subr.bf16.mxu0 (!%p131_p3), %v832_v0  ;;  %792 = vmatprep.subr.bf16.mxu1 (!%p131_p3), %v832_v0  ;;  %v835_v3 = vld [vmem:[%s962_s1 + $0x18] sm:$0xff] (!%p131_p3)   ;;  %v836_v6 = vld [vmem:[%s962_s1 + $0x20] sm:$0xff] (!%p131_p3)   ;;  %v837_v7 = vld [vmem:[%s962_s1 + $0x28] sm:$0xff] (!%p131_p3)  }
   0x8   : > { %761 = vmatpush3.bf16.msra.mxu0 (!%p131_p3), %v832_v0  ;;  %800 = vmatpush3.bf16.msra.mxu1 (!%p131_p3), %v832_v0  ;;  %v838_v8 = vld [vmem:[%s962_s1 + $0x30] sm:$0xff] (!%p131_p3)   ;;  %v839_v9 = vld [vmem:[%s962_s1 + $0x38] sm:$0xff] (!%p131_p3)  }
   0x9   : > { %762 = vmatprep.subr.bf16.mxu0 (!%p131_p3), %v833_v1  ;;  %793 = vmatprep.subr.bf16.mxu1 (!%p131_p3), %v833_v1 }
   0xc   : > { %763 = vmatpush3.bf16.msra.mxu0 (!%p131_p3), %v833_v1  ;;  %801 = vmatpush3.bf16.msra.mxu1 (!%p131_p3), %v833_v1 }
   0xd   : > { %764 = vmatprep.subr.bf16.mxu0 (!%p131_p3), %v834_v2  ;;  %794 = vmatprep.subr.bf16.mxu1 (!%p131_p3), %v834_v2 }
   0xe   : > { %s969_s15 = smov (!%p156_p4, %s643_s15), 63 }
   0xf   : > { %s644_s20 = sshll.u32 %s969_s15, 2 }
  0x10   : > { %s922_s23 = scalar_lea.vmem %s961_s0, %s644_s20  ;;  %765 = vmatpush3.bf16.msra.mxu0 %v834_v2  ;;  %802 = vmatpush3.bf16.msra.mxu1 %v834_v2  ;;  %s168_s8 = scalar_lea.vmem %s963_s2, %s644_s20 }
  0x11   : > { %v840_v4 = vld [vmem:[%s922_s23] sm:$0xff]   ;;  %766 = vmatprep.subr.bf16.mxu0 %v835_v3  ;;  %795 = vmatprep.subr.bf16.mxu1 %v835_v3  ;;  %v842_v10 = vld [vmem:[%s922_s23 + $0x8] sm:$0xff]   ;;  %v844_v12 = vld [vmem:[%s922_s23 + $0x10] sm:$0xff]  }
  0x12   : > { %v841_v5 = vld [vmem:[%s922_s23 + $0x20] sm:$0xff]   ;;  %776 = vmatprep.mubr.bf16.mxu0 %v840_v4  ;;  %v843_v11 = vld [vmem:[%s922_s23 + $0x28] sm:$0xff]   ;;  %v845_v13 = vld [vmem:[%s922_s23 + $0x30] sm:$0xff]  }
  0x13   : > { %784 = vmatprep.mubr.bf16.mxu1 %v841_v5  ;;  %v846_v14 = vld [vmem:[%s922_s23 + $0x18] sm:$0xff]  }
  0x14   : > { %767 = vmatpush3.bf16.msra.mxu0 %v835_v3  ;;  %803 = vmatpush3.bf16.msra.mxu1 %v835_v3  ;;  %v847_v15 = vld [vmem:[%s922_s23 + $0x38] sm:$0xff]  }
  0x15   : > { %768 = vmatprep.subr.bf16.mxu0 %v836_v6  ;;  %796 = vmatprep.subr.bf16.mxu1 %v836_v6 }
  0x18   : > { %769 = vmatpush3.bf16.msra.mxu0 %v836_v6  ;;  %804 = vmatpush3.bf16.msra.mxu1 %v836_v6 }
  0x19   : > { %770 = vmatprep.subr.bf16.mxu0 %v837_v7  ;;  %797 = vmatprep.subr.bf16.mxu1 %v837_v7 }
  0x1c   : > { %771 = vmatpush3.bf16.msra.mxu0 %v837_v7  ;;  %805 = vmatpush3.bf16.msra.mxu1 %v837_v7 }
  0x1d   : > { %772 = vmatprep.subr.bf16.mxu0 %v838_v8  ;;  %798 = vmatprep.subr.bf16.mxu1 %v838_v8 }
  0x20   : > { %773 = vmatpush3.bf16.msra.mxu0 %v838_v8  ;;  %806 = vmatpush3.bf16.msra.mxu1 %v838_v8 }
  0x21   : > { %774 = vmatprep.subr.bf16.mxu0 %v839_v9  ;;  %799 = vmatprep.subr.bf16.mxu1 %v839_v9 }
  0x24   : > { %775 = vmatpush3.bf16.msra.mxu0 %v839_v9  ;;  %807 = vmatpush3.bf16.msra.mxu1 %v839_v9 }
  0x27   : > { %777 = vmatmul.mubr.bf16.vlgmr.msra.gmra.mrb[0].mxu0 %v842_v10  ;;  %785 = vmatmul.mubr.bf16.vlgmr.msra.gmra.mrb[0].mxu1 %v843_v11 }
  0x28   : > { %780 = vmatprep.mubr.bf16.mxu0 %v844_v12  ;;  %788 = vmatprep.mubr.bf16.mxu1 %v845_v13 }
  0x2f   : > { %781 = vmatmul.mubr.bf16.gmra.mrb[4].mxu0 %v846_v14  ;;  %789 = vmatmul.mubr.bf16.gmra.mrb[4].mxu1 %v847_v15 }
  0xfa   : > { %v778_v16 = vpop.f32.mrb[0].mxu0  ;;  %v786_v17 = vpop.f32.mrb[0].mxu1 }
  0xfb   : > { %v374_v18 = vpop.f32.mrb[1].mxu0  ;;  %v406_v19 = vpop.f32.mrb[1].mxu1 }
  0xfc   : > { %v779_v20 = vpop.f32.mrb[2].mxu0  ;;  %v787_v21 = vpop.f32.mrb[2].mxu1 }
  0xfd   : > { %v705_v22 = vpack.c.bf16 %v779_v20, %v778_v16  ;;  %v725_v23 = vpack.c.bf16 %v787_v21, %v786_v17  ;;  %v377_v24 = vpop.f32.mrb[3].mxu0  ;;  %v409_v25 = vpop.f32.mrb[3].mxu1 }
  0xfe   : > { %v700_v26 = vpack.c.bf16 %v377_v24, %v374_v18  ;;  %v720_v27 = vpack.c.bf16 %v409_v25, %v406_v19 }
  0xff   : > { %737 = vst [vmem:[%s168_s8 + $0x8] sm:$0xff] %v705_v22   ;;  %741 = vst [vmem:[%s168_s8 + $0x28] sm:$0xff] %v725_v23  }
 0x100   : > { %701 = vst [vmem:[%s168_s8] sm:$0xff] %v700_v26   ;;  %740 = vst [vmem:[%s168_s8 + $0x20] sm:$0xff] %v720_v27  }
 0x102   : > { %v782_v28 = vpop.f32.mrb[4].mxu0  ;;  %v790_v29 = vpop.f32.mrb[4].mxu1 }
 0x103   : > { %v390_v30 = vpop.f32.mrb[5].mxu0  ;;  %v422_v31 = vpop.f32.mrb[5].mxu1 }
 0x104   : > { %v783_v32 = vpop.f32.mrb[6].mxu0  ;;  %v791_v33 = vpop.f32.mrb[6].mxu1 }
 0x105   : > { %v715_v34 = vpack.c.bf16 %v783_v32, %v782_v28  ;;  %v735_v35 = vpack.c.bf16 %v791_v33, %v790_v29  ;;  %v393_v36 = vpop.f32.mrb[7].mxu0  ;;  %v425_v37 = vpop.f32.mrb[7].mxu1 }
 0x106   : > { %v710_v38 = vpack.c.bf16 %v393_v36, %v390_v30  ;;  %v730_v39 = vpack.c.bf16 %v425_v37, %v422_v31 }
 0x107   : > { %739 = vst [vmem:[%s168_s8 + $0x18] sm:$0xff] %v715_v34   ;;  %743 = vst [vmem:[%s168_s8 + $0x38] sm:$0xff] %v735_v35  }
 0x108   : > { %738 = vst [vmem:[%s168_s8 + $0x10] sm:$0xff] %v710_v38   ;;  %742 = vst [vmem:[%s168_s8 + $0x30] sm:$0xff] %v730_v39  }
 0x109 PF: > { %s12_s11 = sadd.s32 1, %s870_s11   ;;  %s964_s9 = smov %s866_s10 }
 0x10a   : > { %p9_p5 = scmp.ge.s32.totalorder %s12_s11, 6   ;;  %s965_s10 = smov %s967_s12 }
 0x10c   :  { %11 = sbr.rel (!%p9_p5) target bundleno = 2 (0x2), region = 67 }

</bundles_post_ra>
